<compile_context>
chip_gen: v6e
topology: v6e:2x2x1
jax: 0.10.0
libtpu: 0.0.40
codegen_flags: <defaults>
</compile_context>

<pallas_src>
import functools

import jax
import jax.numpy as jnp
from jax.experimental import pallas as pl
from jax.experimental.pallas import tpu as pltpu

# Small, deterministic hyper-parameters (UberNCE defaults scaled down).
DIM = 32            # contrastive feature dimension (module default 128)
K_QUEUE = 256       # queue size (module default 2048)
TEMPERATURE = 0.07  # softmax temperature
FEATURE_SIZE = 64   # backbone "feature_size" from select_backbone()
IN_CHANNELS = 3

VMEM_LIMIT_BYTES = 48 * 1024 * 1024       # < v7x's 64 MiB/TC physical VMEM
X_STREAM_BUDGET_BYTES = 24 * 1024 * 1024  # double-buffered streamed-x budget
MAX_BLOCK_LANES = 32768                   # cap on the streaming tile width


def _round_up(x, m):
    return ((x + m - 1) // m) * m


def _choose_tiling(S, max_block):
    """Pick (block_s, S_pad, acc_lanes). block_s divides S_pad, S_pad >= S."""
    max_block = max(512, (max_block // 512) * 512)
    if S % 128 == 0:
        # Try a divisor of S (no padding pass needed in the wrapper).
        b = min(max_block, S)
        b -= b % 128
        while b >= 128 and S % b != 0:
            b -= 128
        if b >= min(4096, S):            # big enough block -> take it, no pad
            al = 512 if b % 512 == 0 else (256 if b % 256 == 0 else 128)
            return b, S, al
    # Zero-pad S (exact for a sum; the mean keeps using the true S).
    if S <= max_block:
        b = _round_up(S, 512)
        return b, b, 512
    return max_block, _round_up(S, max_block), 512


# ---------------------------------------------------------------------------
# Fused kernel:
#   AdaptiveAvgPool3d((1,1,1))   (streamed over S; lane-wide VMEM accumulator)
#   -> [folded backbone + Conv3d(F,F,1)] -> ReLU -> Conv3d(F,dim,1)
#      (BOTH encoders at once via block-diagonal weights)
#   -> F.normalize(dim=1) for q and k
#   -> l_pos = sum(q*k, -1), l_neg = q @ queue, scaled by 1/T
# TODO(synk): the real S3D backbone (select_backbone) is not available here; it
# is replaced by a 1x1x1 Conv3d (channel-wise linear map), which commutes with
# global average pooling and is folded into the first head layer.
# ---------------------------------------------------------------------------
def _uber_nce_kernel(x_ref, seg_ref, w1bd_ref, b1bd_ref, w2bd_ref, b2all_ref,
                     queue_ref, lpos_ref, lneg_ref, acc_ref,
                     *, inv_S, inv_T, acc_lanes, batch):
    s = pl.program_id(0)
    rows, block_s = x_ref.shape
    nslices = block_s // acc_lanes

    @pl.when(s == 0)
    def _init():
        acc_ref[...] = jnp.zeros_like(acc_ref)

    # Streamed global average pool: add 128*k-lane slices (pure VALU work); the
    # single cross-lane XLU reduce is deferred to the finalize step.
    if rows * acc_lanes * 4 <= 96 * 1024:     # keep the partial in registers
        partial = x_ref[:, 0:acc_lanes].astype(jnp.float32)
        for j in range(1, nslices):
            partial = partial + x_ref[:, j * acc_lanes:(j + 1) * acc_lanes].astype(jnp.float32)
        acc_ref[...] += partial
    else:                                     # large-row configs: accumulate in VMEM
        for j in range(nslices):
            acc_ref[...] += x_ref[:, j * acc_lanes:(j + 1) * acc_lanes].astype(jnp.float32)

    @pl.when(s == pl.num_programs(0) - 1)
    def _finalize():
        # pooled features for every (batch, clip, channel) row: (2*B*C, 1)
        pooled = jnp.sum(acc_ref[...], axis=-1, keepdims=True) * inv_S
        # layer 1 of BOTH heads: segment-sum against block-diagonal weights.
        h = jnp.dot(seg_ref[...], pooled * w1bd_ref[...],
                    preferred_element_type=jnp.float32) + b1bd_ref[...]  # (2B, 2F)
        h = jnp.maximum(h, 0.0)                                          # ReLU
        # layer 2 of BOTH heads -> (2B, DIM), then F.normalize(dim=1).
        z = jnp.dot(h, w2bd_ref[...],
                    preferred_element_type=jnp.float32) + b2all_ref[...]
        norm = jnp.sqrt(jnp.sum(z * z, axis=-1, keepdims=True))
        z = z / jnp.maximum(norm, 1e-12)
        q = z[:batch]            # query rows
        k = z[batch:]            # key rows
        lpos_ref[...] = jnp.sum(q * k, axis=-1, keepdims=True) * inv_T       # (B, 1)
        lneg_ref[...] = jnp.dot(q, queue_ref[...],
                                preferred_element_type=jnp.float32) * inv_T  # (B, K)


def _fused_logits(x_all, seg, w1bd, b1bd, w2bd, b2all, queue, T, batch):
    rows, S = x_all.shape                 # rows = 2 * B * C (true S, unpadded)
    D, K = queue.shape
    rows_pad = _round_up(rows, 8)

    # Largest streaming tile that keeps the double-buffered x stream in budget.
    max_block = X_STREAM_BUDGET_BYTES // (2 * rows_pad * 4)
    max_block = max(512, min(MAX_BLOCK_LANES, (max_block // 512) * 512))
    block_s, S_pad, acc_lanes = _choose_tiling(S, max_block)

    if S_pad != S:
        # Zeros are exact for the streamed sum; inv_S below keeps the true S.
        # (Costs one extra XLA pass over the activation; only taken when S has
        #  no lane-aligned tiling.)
        x_all = jnp.pad(x_all, ((0, 0), (0, S_pad - S)))

    grid = (S_pad // block_s,)

    def full_spec(a):
        return pl.BlockSpec(a.shape, lambda s: (0, 0))
    # TODO(synk): at the real config (DIM=128, K=2048) single-buffer these
    # constant-index params via pipeline_mode=pl.Buffered(1) to reclaim VMEM.

    kernel = functools.partial(
        _uber_nce_kernel, inv_S=1.0 / float(S), inv_T=1.0 / float(T),
        acc_lanes=acc_lanes, batch=batch)

    l_pos, l_neg = pl.pallas_call(
        kernel,
        out_shape=(jax.ShapeDtypeStruct((batch, 1), jnp.float32),
                   jax.ShapeDtypeStruct((batch, K), jnp.float32)),
        grid_spec=pltpu.PrefetchScalarGridSpec(
            num_scalar_prefetch=0,
            grid=grid,
            in_specs=[pl.BlockSpec((rows, block_s), lambda s: (0, s)),
                      full_spec(seg), full_spec(w1bd), full_spec(b1bd),
                      full_spec(w2bd), full_spec(b2all), full_spec(queue)],
            out_specs=(pl.BlockSpec((batch, 1), lambda s: (0, 0)),
                       pl.BlockSpec((batch, K), lambda s: (0, 0))),
            scratch_shapes=[pltpu.VMEM((rows, acc_lanes), jnp.float32)]),
        compiler_params=pltpu.CompilerParams(
            dimension_semantics=("arbitrary",),      # S is a reduction axis
            vmem_limit_bytes=VMEM_LIMIT_BYTES),
    )(x_all, seg, w1bd, b1bd, w2bd, b2all, queue)
    return l_pos, l_neg


def _fold_backbone(p):
    """Fold the 1x1x1-conv backbone stand-in into the first head layer (exact)."""
    w1f = jnp.dot(p["wb"], p["w1"])              # (C, F)
    b1f = jnp.dot(p["bb"], p["w1"]) + p["b1"]    # (1, F)
    return (w1f, b1f, p["w2"], p["b2"])


def _build_fused_head_params(pq, pk, B, C):
    """Block-diagonal head weights so both encoders run as ONE pair of matmuls.

    x rows are ordered (b, clip, c) = b*2C + clip*C + c (pure reshape of
    `block`); head output rows are ordered q (0..B-1) then k (B..2B-1).
    """
    w1q, b1q, w2q, b2q = pq
    w1k, b1k, w2k, b2k = pk
    F = w1q.shape[1]

    zCF = jnp.zeros((C, F), jnp.float32)
    per_batch = jnp.concatenate(
        [jnp.concatenate([w1q, zCF], axis=1),        # clip 0 (query) rows
         jnp.concatenate([zCF, w1k], axis=1)], axis=0)   # clip 1 (key) rows
    w1bd = jnp.tile(per_batch, (B, 1))                                    # (2BC, 2F)

    zBF = jnp.zeros((B, F), jnp.float32)
    b1bd = jnp.concatenate(
        [jnp.concatenate([jnp.tile(b1q, (B, 1)), zBF], axis=1),
         jnp.concatenate([zBF, jnp.tile(b1k, (B, 1))], axis=1)], axis=0)  # (2B, 2F)

    w2bd = jnp.concatenate([w2q, w2k], axis=0)                            # (2F, DIM)
    b2all = jnp.concatenate([jnp.tile(b2q, (B, 1)),
                             jnp.tile(b2k, (B, 1))], axis=0)              # (2B, DIM)

    # Segment-select matrix: output row (q: b | k: B+b) sums input rows (b, clip, :).
    r = jnp.arange(2 * B * C)
    out_of_row = jnp.where((r // C) % 2 == 0, r // (2 * C), B + r // (2 * C))
    seg = (out_of_row[None, :] == jnp.arange(2 * B)[:, None]).astype(jnp.float32)
    return seg, w1bd, b1bd, w2bd, b2all


# ---------------------------------------------------------------------------
# UberNCE.forward (inference semantics: requires_grad == False).
#   - concat_all_gather is the identity for world_size == 1.
#   - batch shuffle/unshuffle cancel out (no cross-sample ops in the head).
# TODO(synk): momentum key-encoder update and _dequeue_and_enqueue are training-
# time, in-place buffer mutations guarded by `in_train_mode`; skipped here.
# ---------------------------------------------------------------------------
@functools.partial(jax.jit, static_argnames=("T",))
def uber_nce_forward(block, k_label, params_q, params_k, queue, queue_label,
                     T=TEMPERATURE):
    B = block.shape[0]
    assert block.shape[1] == 2
    C = block.shape[2]
    S = 1
    for d in block.shape[3:]:
        S *= d
    # (B, 2, C, T, H, W) row-major-flattens to (B*2*C, S) with NO data movement:
    # both clips stream through one DMA pipeline, B*2*C fills the sublane axis.
    x_all = block.reshape(B * 2 * C, S)

    pq = _fold_backbone(params_q)
    pk = _fold_backbone(params_k)
    seg, w1bd, b1bd, w2bd, b2all = _build_fused_head_params(pq, pk, B, C)

    l_pos, l_neg = _fused_logits(x_all, seg, w1bd, b1bd, w2bd, b2all, queue, T, B)

    logits = jnp.concatenate([l_pos, l_neg], axis=1)       # (B, K+1), already / T
    # positive-pair mask: trivial VPU compare, done in XLA (not in the kernel)
    eq = k_label[:, None].astype(jnp.int32) == queue_label[None, :].astype(jnp.int32)
    mask = jnp.concatenate([jnp.ones((B, 1), dtype=bool), eq], axis=1)
    return logits, mask


def init_params(key):
    ks = jax.random.split(key, 8)
    scale = 0.05
    params_q = {
        "wb": scale * jax.random.normal(ks[0], (IN_CHANNELS, FEATURE_SIZE), jnp.float32),
        "bb": scale * jax.random.normal(ks[1], (1, FEATURE_SIZE), jnp.float32),
        "w1": scale * jax.random.normal(ks[2], (FEATURE_SIZE, FEATURE_SIZE), jnp.float32),
        "b1": scale * jax.random.normal(ks[3], (1, FEATURE_SIZE), jnp.float32),
        "w2": scale * jax.random.normal(ks[4], (FEATURE_SIZE, DIM), jnp.float32),
        "b2": scale * jax.random.normal(ks[5], (1, DIM), jnp.float32),
    }
    # encoder_k starts as an exact copy of encoder_q in the module and drifts
    # under the momentum update; use a perturbed copy here so the q/k weight
    # routing inside the fused kernel is actually exercised.
    params_k = {name: v * 1.01 + 0.002 for name, v in params_q.items()}
    # queue: randn(dim, K), each column L2-normalized (dim=0)
    queue = jax.random.normal(ks[6], (DIM, K_QUEUE), jnp.float32)
    queue = queue / jnp.maximum(
        jnp.sqrt(jnp.sum(queue * queue, axis=0, keepdims=True)), 1e-12)
    queue_label = -jnp.ones((K_QUEUE,), dtype=jnp.int32)
    return params_q, params_k, queue, queue_label


def _reference_forward(block, k_label, params_q, params_k, queue, queue_label, T):
    """Pure-JAX reference with the original (unfolded, per-encoder) op order."""
    B = block.shape[0]
    C = block.shape[2]

    def enc(x, p):
        pooled = jnp.mean(x.reshape(B, C, -1), axis=-1)
        h0 = pooled @ p["wb"] + p["bb"]
        h1 = jnp.maximum(h0 @ p["w1"] + p["b1"], 0.0)
        z = h1 @ p["w2"] + p["b2"]
        return z / jnp.maximum(jnp.linalg.norm(z, axis=-1, keepdims=True), 1e-12)

    q = enc(block[:, 0], params_q)
    k = enc(block[:, 1], params_k)
    l_pos = jnp.sum(q * k, axis=-1, keepdims=True)
    l_neg = q @ queue
    logits = jnp.concatenate([l_pos, l_neg], axis=1) / T
    mask = jnp.concatenate(
        [jnp.ones((B, 1), dtype=bool), k_label[:, None] == queue_label[None, :]],
        axis=1)
    return logits, mask


if __name__ == "__main__":
    key = jax.random.PRNGKey(0)
    k_param, k_block, k_lab = jax.random.split(key, 3)

    params_q, params_k, queue, queue_label = init_params(k_param)

    # block: (B, 2 clips, C, T, H, W) -- NCDHW per clip, like the PyTorch module.
    # S = T*H*W = 2048 (lane-aligned, streamed by the pooling grid axis).
    B, T, H, W = 2, 4, 16, 32
    block = jax.random.normal(k_block, (B, 2, IN_CHANNELS, T, H, W), jnp.float32)
    k_label = jax.random.randint(k_lab, (B,), 0, 5, dtype=jnp.int32)

    logits, mask = uber_nce_forward(block, k_label, params_q, params_k,
                                    queue, queue_label)
    jax.block_until_ready((logits, mask))

    assert logits.shape == (B, K_QUEUE + 1) and logits.dtype == jnp.float32
    assert mask.shape == (B, K_QUEUE + 1) and mask.dtype == jnp.bool_
    assert bool(jnp.all(mask[:, 0]))  # positive-pair column is always True

    ref_logits, ref_mask = _reference_forward(block, k_label, params_q, params_k,
                                              queue, queue_label, TEMPERATURE)
    assert bool(jnp.allclose(logits, ref_logits, rtol=1e-3, atol=1e-3))
    assert bool(jnp.all(mask == ref_mask))

    print("KERNEL_OK")
</pallas_src>

<mosaic_0001>
module attributes {stable_mosaic.version = 11 : i64} {
  func.func @_uber_nce_kernel(%arg0: i32, %arg1: memref<12x2048xf32, #tpu.memory_space<vmem>>, %arg2: memref<4x12xf32, #tpu.memory_space<vmem>>, %arg3: memref<12x128xf32, #tpu.memory_space<vmem>>, %arg4: memref<4x128xf32, #tpu.memory_space<vmem>>, %arg5: memref<128x32xf32, #tpu.memory_space<vmem>>, %arg6: memref<4x32xf32, #tpu.memory_space<vmem>>, %arg7: memref<32x256xf32, #tpu.memory_space<vmem>>, %arg8: memref<2x1xf32, #tpu.memory_space<vmem>>, %arg9: memref<2x256xf32, #tpu.memory_space<vmem>>, %arg10: memref<12x512xf32, #tpu.memory_space<vmem>>) attributes {dimension_semantics = [#tpu.dimension_semantics<arbitrary>], iteration_bounds = array<i64: 1>, scalar_prefetch = 0 : i64, scratch_operands = 1 : i64, tpu.core_type = #tpu.core_type<tc>, window_params = [{transform_indices = @transform_0, window_bounds = array<i64: 12, 2048>}, {pipeline_mode = #tpu.pipeline_mode<synchronous>, transform_indices = @transform_1, window_bounds = array<i64: 4, 12>}, {pipeline_mode = #tpu.pipeline_mode<synchronous>, transform_indices = @transform_2, window_bounds = array<i64: 12, 128>}, {pipeline_mode = #tpu.pipeline_mode<synchronous>, transform_indices = @transform_3, window_bounds = array<i64: 4, 128>}, {pipeline_mode = #tpu.pipeline_mode<synchronous>, transform_indices = @transform_4, window_bounds = array<i64: 128, 32>}, {pipeline_mode = #tpu.pipeline_mode<synchronous>, transform_indices = @transform_5, window_bounds = array<i64: 4, 32>}, {pipeline_mode = #tpu.pipeline_mode<synchronous>, transform_indices = @transform_6, window_bounds = array<i64: 32, 256>}, {pipeline_mode = #tpu.pipeline_mode<synchronous>, transform_indices = @transform_7, window_bounds = array<i64: 2, 1>}, {pipeline_mode = #tpu.pipeline_mode<synchronous>, transform_indices = @transform_8, window_bounds = array<i64: 2, 256>}]} {
    %c0_i32 = arith.constant 0 : i32
    %0 = arith.cmpi eq, %arg0, %c0_i32 : i32
    %1 = arith.extui %0 : i1 to i32
    %c0_i32_0 = arith.constant 0 : i32
    %2 = arith.cmpi ne, %1, %c0_i32_0 : i32
    scf.if %2 {
      %cst = arith.constant 0.000000e+00 : f32
      %16 = vector.broadcast %cst : f32 to vector<12x512xf32>
      %c0_11 = arith.constant 0 : index
      %c0_12 = arith.constant 0 : index
      %17 = vector.load %arg10[%c0_11, %c0_12] : memref<12x512xf32, #tpu.memory_space<vmem>>, vector<12x512xf32>
      tpu.vector_store %arg10[%c0_11, %c0_12], %16 {strides = array<i32>} : memref<12x512xf32, #tpu.memory_space<vmem>>, vector<12x512xf32>,
    } else {
    }
    %c0 = arith.constant 0 : index
    %c0_1 = arith.constant 0 : index
    %3 = vector.load %arg1[%c0, %c0_1] : memref<12x2048xf32, #tpu.memory_space<vmem>>, vector<12x512xf32>
    %c0_2 = arith.constant 0 : index
    %c512 = arith.constant 512 : index
    %4 = vector.load %arg1[%c0_2, %c512] : memref<12x2048xf32, #tpu.memory_space<vmem>>, vector<12x512xf32>
    %5 = arith.addf %3, %4 : vector<12x512xf32>
    %c0_3 = arith.constant 0 : index
    %c1024 = arith.constant 1024 : index
    %6 = vector.load %arg1[%c0_3, %c1024] : memref<12x2048xf32, #tpu.memory_space<vmem>>, vector<12x512xf32>
    %7 = arith.addf %5, %6 : vector<12x512xf32>
    %c0_4 = arith.constant 0 : index
    %c1536 = arith.constant 1536 : index
    %8 = vector.load %arg1[%c0_4, %c1536] : memref<12x2048xf32, #tpu.memory_space<vmem>>, vector<12x512xf32>
    %9 = arith.addf %7, %8 : vector<12x512xf32>
    %c0_5 = arith.constant 0 : index
    %c0_6 = arith.constant 0 : index
    %10 = vector.load %arg10[%c0_5, %c0_6] : memref<12x512xf32, #tpu.memory_space<vmem>>, vector<12x512xf32>
    %11 = arith.addf %10, %9 : vector<12x512xf32>
    %c0_7 = arith.constant 0 : index
    %c0_8 = arith.constant 0 : index
    %12 = vector.load %arg10[%c0_7, %c0_8] : memref<12x512xf32, #tpu.memory_space<vmem>>, vector<12x512xf32>
    tpu.vector_store %arg10[%c0_7, %c0_8], %11 {strides = array<i32>} : memref<12x512xf32, #tpu.memory_space<vmem>>, vector<12x512xf32>,
    %c0_i32_9 = arith.constant 0 : i32
    %13 = arith.cmpi eq, %arg0, %c0_i32_9 : i32
    %14 = arith.extui %13 : i1 to i32
    %c0_i32_10 = arith.constant 0 : i32
    %15 = arith.cmpi ne, %14, %c0_i32_10 : i32
    scf.if %15 {
      %c0_11 = arith.constant 0 : index
      %c0_12 = arith.constant 0 : index
      %16 = vector.load %arg10[%c0_11, %c0_12] : memref<12x512xf32, #tpu.memory_space<vmem>>, vector<12x512xf32>
      %cst = arith.constant dense<0.000000e+00> : vector<12xf32>
      %17 = vector.multi_reduction <add>, %16, %cst [1] : vector<12x512xf32> to vector<12xf32>
      %18 = vector.shape_cast %17 : vector<12xf32> to vector<12x1xf32>
      %cst_13 = arith.constant 4.8828125E-4 : f32
      %19 = vector.broadcast %cst_13 : f32 to vector<12x1xf32>
      %20 = arith.mulf %18, %19 : vector<12x1xf32>
      %c0_14 = arith.constant 0 : index
      %c0_15 = arith.constant 0 : index
      %21 = vector.load %arg2[%c0_14, %c0_15] : memref<4x12xf32, #tpu.memory_space<vmem>>, vector<4x12xf32>
      %c0_16 = arith.constant 0 : index
      %c0_17 = arith.constant 0 : index
      %22 = vector.load %arg3[%c0_16, %c0_17] : memref<12x128xf32, #tpu.memory_space<vmem>>, vector<12x128xf32>
      %23 = vector.broadcast %20 : vector<12x1xf32> to vector<12x128xf32>
      %24 = arith.mulf %23, %22 : vector<12x128xf32>
      %cst_18 = arith.constant dense<0.000000e+00> : vector<4x128xf32>
      %25 = tpu.matmul %21, %24, %cst_18 {dimension_numbers = #tpu.dot_dimension_numbers<[1], [0], [0], [1], [0, 0, 1, 1], [], []>} : vector<4x12xf32>, vector<12x128xf32>, vector<4x128xf32> -> vector<4x128xf32>
      %c0_19 = arith.constant 0 : index
      %c0_20 = arith.constant 0 : index
      %26 = vector.load %arg4[%c0_19, %c0_20] : memref<4x128xf32, #tpu.memory_space<vmem>>, vector<4x128xf32>
      %27 = arith.addf %25, %26 : vector<4x128xf32>
      %cst_21 = arith.constant 0.000000e+00 : f32
      %28 = vector.broadcast %cst_21 : f32 to vector<4x128xf32>
      %29 = arith.maximumf %27, %28 : vector<4x128xf32>
      %c0_22 = arith.constant 0 : index
      %c0_23 = arith.constant 0 : index
      %30 = vector.load %arg5[%c0_22, %c0_23] : memref<128x32xf32, #tpu.memory_space<vmem>>, vector<128x32xf32>
      %cst_24 = arith.constant dense<0.000000e+00> : vector<4x32xf32>
      %31 = tpu.matmul %29, %30, %cst_24 {dimension_numbers = #tpu.dot_dimension_numbers<[1], [0], [0], [1], [0, 0, 1, 1], [], []>} : vector<4x128xf32>, vector<128x32xf32>, vector<4x32xf32> -> vector<4x32xf32>
      %c0_25 = arith.constant 0 : index
      %c0_26 = arith.constant 0 : index
      %32 = vector.load %arg6[%c0_25, %c0_26] : memref<4x32xf32, #tpu.memory_space<vmem>>, vector<4x32xf32>
      %33 = arith.addf %31, %32 : vector<4x32xf32>
      %34 = arith.mulf %33, %33 : vector<4x32xf32>
      %cst_27 = arith.constant dense<0.000000e+00> : vector<4xf32>
      %35 = vector.multi_reduction <add>, %34, %cst_27 [1] : vector<4x32xf32> to vector<4xf32>
      %36 = vector.shape_cast %35 : vector<4xf32> to vector<4x1xf32>
      %37 = math.sqrt %36 : vector<4x1xf32>
      %cst_28 = arith.constant 9.99999996E-13 : f32
      %38 = vector.broadcast %cst_28 : f32 to vector<4x1xf32>
      %39 = arith.maximumf %37, %38 : vector<4x1xf32>
      %40 = vector.broadcast %39 : vector<4x1xf32> to vector<4x32xf32>
      %41 = arith.divf %33, %40 : vector<4x32xf32>
      %42 = vector.extract_strided_slice %41 {offsets = [0, 0], sizes = [2, 32], strides = [1, 1]} : vector<4x32xf32> to vector<2x32xf32>
      %43 = vector.extract_strided_slice %41 {offsets = [2, 0], sizes = [2, 32], strides = [1, 1]} : vector<4x32xf32> to vector<2x32xf32>
      %44 = arith.mulf %42, %43 : vector<2x32xf32>
      %cst_29 = arith.constant dense<0.000000e+00> : vector<2xf32>
      %45 = vector.multi_reduction <add>, %44, %cst_29 [1] : vector<2x32xf32> to vector<2xf32>
      %46 = vector.shape_cast %45 : vector<2xf32> to vector<2x1xf32>
      %cst_30 = arith.constant 14.2857141 : f32
      %47 = vector.broadcast %cst_30 : f32 to vector<2x1xf32>
      %48 = arith.mulf %46, %47 : vector<2x1xf32>
      %c0_31 = arith.constant 0 : index
      %c0_32 = arith.constant 0 : index
      %49 = vector.load %arg8[%c0_31, %c0_32] : memref<2x1xf32, #tpu.memory_space<vmem>>, vector<2x1xf32>
      tpu.vector_store %arg8[%c0_31, %c0_32], %48 {strides = array<i32>} : memref<2x1xf32, #tpu.memory_space<vmem>>, vector<2x1xf32>,
      %c0_33 = arith.constant 0 : index
      %c0_34 = arith.constant 0 : index
      %50 = vector.load %arg7[%c0_33, %c0_34] : memref<32x256xf32, #tpu.memory_space<vmem>>, vector<32x256xf32>
      %cst_35 = arith.constant dense<0.000000e+00> : vector<2x256xf32>
      %51 = tpu.matmul %42, %50, %cst_35 {dimension_numbers = #tpu.dot_dimension_numbers<[1], [0], [0], [1], [0, 0, 1, 1], [], []>} : vector<2x32xf32>, vector<32x256xf32>, vector<2x256xf32> -> vector<2x256xf32>
      %cst_36 = arith.constant 14.2857141 : f32
      %52 = vector.broadcast %cst_36 : f32 to vector<2x256xf32>
      %53 = arith.mulf %51, %52 : vector<2x256xf32>
      %c0_37 = arith.constant 0 : index
      %c0_38 = arith.constant 0 : index
      %54 = vector.load %arg9[%c0_37, %c0_38] : memref<2x256xf32, #tpu.memory_space<vmem>>, vector<2x256xf32>
      tpu.vector_store %arg9[%c0_37, %c0_38], %53 {strides = array<i32>} : memref<2x256xf32, #tpu.memory_space<vmem>>, vector<2x256xf32>,
    } else {
    }
    return
  }
  func.func @transform_0(%arg0: i32) -> (i32, i32) {
    %c0_i32 = arith.constant 0 : i32
    %c0_i32_0 = arith.constant 0 : i32
    return %c0_i32, %arg0 : i32, i32
  }
  func.func @transform_1(%arg0: i32) -> (i32, i32) {
    %c0_i32 = arith.constant 0 : i32
    %c0_i32_0 = arith.constant 0 : i32
    %c0_i32_1 = arith.constant 0 : i32
    return %c0_i32, %c0_i32_0 : i32, i32
  }
  func.func @transform_2(%arg0: i32) -> (i32, i32) {
    %c0_i32 = arith.constant 0 : i32
    %c0_i32_0 = arith.constant 0 : i32
    %c0_i32_1 = arith.constant 0 : i32
    return %c0_i32, %c0_i32_0 : i32, i32
  }
  func.func @transform_3(%arg0: i32) -> (i32, i32) {
    %c0_i32 = arith.constant 0 : i32
    %c0_i32_0 = arith.constant 0 : i32
    %c0_i32_1 = arith.constant 0 : i32
    return %c0_i32, %c0_i32_0 : i32, i32
  }
  func.func @transform_4(%arg0: i32) -> (i32, i32) {
    %c0_i32 = arith.constant 0 : i32
    %c0_i32_0 = arith.constant 0 : i32
    %c0_i32_1 = arith.constant 0 : i32
    return %c0_i32, %c0_i32_0 : i32, i32
  }
  func.func @transform_5(%arg0: i32) -> (i32, i32) {
    %c0_i32 = arith.constant 0 : i32
    %c0_i32_0 = arith.constant 0 : i32
    %c0_i32_1 = arith.constant 0 : i32
    return %c0_i32, %c0_i32_0 : i32, i32
  }
  func.func @transform_6(%arg0: i32) -> (i32, i32) {
    %c0_i32 = arith.constant 0 : i32
    %c0_i32_0 = arith.constant 0 : i32
    %c0_i32_1 = arith.constant 0 : i32
    return %c0_i32, %c0_i32_0 : i32, i32
  }
  func.func @transform_7(%arg0: i32) -> (i32, i32) {
    %c0_i32 = arith.constant 0 : i32
    %c0_i32_0 = arith.constant 0 : i32
    %c0_i32_1 = arith.constant 0 : i32
    return %c0_i32, %c0_i32_0 : i32, i32
  }
  func.func @transform_8(%arg0: i32) -> (i32, i32) {
    %c0_i32 = arith.constant 0 : i32
    %c0_i32_0 = arith.constant 0 : i32
    %c0_i32_1 = arith.constant 0 : i32
    return %c0_i32, %c0_i32_0 : i32, i32
  }
}

</mosaic_0001>

<bundles_post_ra>
// kernel: tile.29
= control target key start
LH: loop header
LB: loop body
LE: loop exit
PB: predicated region body
PF: predicated region fallthrough
CT: control target
= control target key end

     0   :  { %s32_s0 = inlined_call_operand.vmem [shape: f32[2,6,128], index: 0, kind: input, shape index: {}]   ;;  %s33_s1 = inlined_call_operand.vmem [shape: f32[12,128], index: 1, kind: output, shape index: {}]  }
   0x1   :  { %v2_v0 = vld [vmem:[%s32_s0] sm:$0x3f]   ;;  %v8_v1 = vld [vmem:[%s32_s0 + $0x8] sm:$0x3f]  }
   0x2   :  { %3 = vst [vmem:[%s33_s1] sm:$0x3f] %v2_v0   ;;  %9 = vst [vmem:[%s33_s1 + $0x6] sm:$0x3f] %v8_v1  }

// kernel: uber_nce_forward.1
= control target key start
LH: loop header
LB: loop body
LE: loop exit
PB: predicated region body
PF: predicated region fallthrough
CT: control target
= control target key end

     0   :  { %v521_v0 = vmov 0.0   ;;  %vm136_vm0 = vcmask 1043456   ;;  %vm522_vm1 = vmmov 0   ;;  %vm154_vm2 = vcmask 97280   ;;  %s787_s0 = inlined_call_operand.vmem [shape: f32[12,2048], index: 0, kind: input, shape index: {}]   ;;  %s788_s4 = inlined_call_operand.vmem [shape: f32[128,32], index: 4, kind: input, shape index: {}]   ;;  %s789_s2 = inlined_call_operand.vmem [shape: f32[12,128], index: 2, kind: input, shape index: {}]   ;;  %s790_s1 = inlined_call_operand.vmem [shape: f32[4,12], index: 1, kind: input, shape index: {}]   ;;  %s791_s3 = inlined_call_operand.vmem [shape: f32[4,128], index: 3, kind: input, shape index: {}]   ;;  %s792_s5 = inlined_call_operand.vmem [shape: f32[4,32], index: 5, kind: input, shape index: {}]   ;;  %s793_s6 = inlined_call_operand.vmem [shape: f32[32,256], index: 6, kind: input, shape index: {}]   ;;  %s794_s7 = inlined_call_operand.vmem [shape: f32[2,1], index: 7, kind: output, shape index: {0}]   ;;  %s795_s8 = inlined_call_operand.vmem [shape: f32[2,256], index: 8, kind: output, shape index: {1}]  }
   0x1   :  { %36 = vst [vmem:[#allocation2 + $0x8] sm:$0xf] %v521_v0  ;;  %37 = vst [vmem:[#allocation2 + $0x20] sm:$0xf] %v521_v0  ;;  %v44_v1 = vld [vmem:[%s787_s0 + $0x80] sm:$0xf]  ;;  %473 = vmatprep.subr.mxu0 %v521_v0  ;;  %480 = vmatprep.subr.mxu1 %v521_v0 }
   0x2   :  { %38 = vst [vmem:[#allocation2 + $0x28] sm:$0xf] %v521_v0  ;;  %39 = vst [vmem:[#allocation2 + $0x38] sm:$0xf] %v521_v0  ;;  %v45_v2 = vld [vmem:[%s787_s0 + $0x88] sm:$0xf]  ;;  %477 = vmatprep.mubr.msk.f32.mxu0 %vm522_vm1, %v521_v0  ;;  %512 = vmatprep.mubr.msk.f32.mxu1 %vm522_vm1, %v521_v0 }
   0x3   :  { %v46_v3 = vld [vmem:[%s787_s0 + $0x90] sm:$0xf]  ;;  %v47_v4 = vld [vmem:[%s787_s0 + $0x98] sm:$0xf]  ;;  %v52_v5 = vld [vmem:[%s787_s0 + $0xa0] sm:$0xf] }
   0x4   :  { %v53_v6 = vld [vmem:[%s787_s0 + $0xa8] sm:$0xf]  ;;  %v54_v7 = vld [vmem:[%s787_s0 + $0xb0] sm:$0xf]  ;;  %v55_v8 = vld [vmem:[%s787_s0 + $0xb8] sm:$0xf]  ;;  %v60_v9 = vadd.f32 %v52_v5, %v44_v1 }
   0x5   :  { %v61_v10 = vadd.f32 %v53_v6, %v45_v2  ;;  %v68_v11 = vld [vmem:[%s787_s0 + $0xc0] sm:$0xf]  ;;  %v62_v12 = vadd.f32 %v54_v7, %v46_v3  ;;  %v63_v13 = vadd.f32 %v55_v8, %v47_v4  ;;  %v69_v14 = vld [vmem:[%s787_s0 + $0xc8] sm:$0xf]  ;;  %v70_v15 = vld [vmem:[%s787_s0 + $0xd0] sm:$0xf] }
   0x6   :  { %v71_v16 = vld [vmem:[%s787_s0 + $0xd8] sm:$0xf]  ;;  %v76_v17 = vadd.f32 %v68_v11, %v60_v9  ;;  %v84_v19 = vld [vmem:[%s787_s0 + $0xe0] sm:$0xf]  ;;  %v85_v20 = vld [vmem:[%s787_s0 + $0xe8] sm:$0xf] }
   0x7   :  { %v77_v18 = vadd.f32 %v69_v14, %v61_v10  ;;  %v86_v21 = vld [vmem:[%s787_s0 + $0xf0] sm:$0xf]  ;;  %v78_v22 = vadd.f32 %v70_v15, %v62_v12  ;;  %v79_v23 = vadd.f32 %v71_v16, %v63_v13  ;;  %v87_v24 = vld [vmem:[%s787_s0 + $0xf8] sm:$0xf]  ;;  %v40_v25 = vld [vmem:[%s787_s0] sm:$0xff]  ;;  %vm320_vm3 = vcmask 257024  }
   0x8   :  { %v41_v26 = vld [vmem:[%s787_s0 + $0x8] sm:$0xff]  ;;  %v92_v27 = vadd.f32 %v84_v19, %v76_v17  ;;  %v42_v29 = vld [vmem:[%s787_s0 + $0x10] sm:$0xff]  ;;  %v43_v30 = vld [vmem:[%s787_s0 + $0x18] sm:$0xff]  ;;  %vm353_vm6 = vcmask 261120   ;;  %vm338_vm7 = vcmask 254976   ;;  %vm343_vm8 = vcmask 1024  }
   0x9   :  { %v93_v28 = vadd.f32 %v85_v20, %v77_v18  ;;  %v48_v31 = vld [vmem:[%s787_s0 + $0x20] sm:$0xff]  ;;  %v94_v32 = vadd.f32 %v86_v21, %v78_v22  ;;  %v95_v33 = vadd.f32 %v87_v24, %v79_v23  ;;  %v100_v34 = vld [vmem:[#allocation2 + $0x8] sm:$0xf]  ;;  %v103_v38 = vld [vmem:[#allocation2 + $0x38] sm:$0xf] }
   0xa   :  { %v101_v35 = vld [vmem:[#allocation2 + $0x20] sm:$0xf]  ;;  %v102_v36 = vld [vmem:[#allocation2 + $0x28] sm:$0xf]  ;;  %v56_v37 = vadd.f32 %v48_v31, %v40_v25  ;;  %v108_v39 = vadd.f32 %v100_v34, %v92_v27  ;;  %v50_v42 = vld [vmem:[%s787_s0 + $0x30] sm:$0xff] }
   0xb   :  { %v109_v40 = vadd.f32 %v101_v35, %v93_v28  ;;  %v49_v41 = vld [vmem:[%s787_s0 + $0x28] sm:$0xff]  ;;  %v110_v43 = vadd.f32 %v102_v36, %v94_v32  ;;  %v111_v44 = vadd.f32 %v103_v38, %v95_v33  ;;  %v51_v45 = vld [vmem:[%s787_s0 + $0x38] sm:$0xff]  ;;  %v58_v47 = vadd.f32 %v50_v42, %v42_v29  ;;  %v64_v48 = vld [vmem:[%s787_s0 + $0x40] sm:$0xff] }
   0xc   :  { %v57_v46 = vadd.f32 %v49_v41, %v41_v26  ;;  %v65_v49 = vld [vmem:[%s787_s0 + $0x48] sm:$0xff]  ;;  %116 = vst [vmem:[#allocation2 + $0x8] sm:$0xf] %v108_v39  ;;  %v59_v50 = vadd.f32 %v51_v45, %v43_v30  ;;  %v66_v51 = vld [vmem:[%s787_s0 + $0x50] sm:$0xff]  ;;  %v67_v52 = vld [vmem:[%s787_s0 + $0x58] sm:$0xff]  ;;  %v72_v53 = vadd.f32 %v64_v48, %v56_v37 }
   0xd   :  { %117 = vst [vmem:[#allocation2 + $0x20] sm:$0xf] %v109_v40  ;;  %v80_v54 = vld [vmem:[%s787_s0 + $0x60] sm:$0xff]  ;;  %118 = vst [vmem:[#allocation2 + $0x28] sm:$0xf] %v110_v43  ;;  %v74_v56 = vadd.f32 %v66_v51, %v58_v47  ;;  %v81_v57 = vld [vmem:[%s787_s0 + $0x68] sm:$0xff] }
   0xe   :  { %119 = vst [vmem:[#allocation2 + $0x38] sm:$0xf] %v111_v44  ;;  %v73_v55 = vadd.f32 %v65_v49, %v57_v46  ;;  %v82_v58 = vld [vmem:[%s787_s0 + $0x70] sm:$0xff]  ;;  %v83_v59 = vld [vmem:[%s787_s0 + $0x78] sm:$0xff]  ;;  %v75_v60 = vadd.f32 %v67_v52, %v59_v50  ;;  %v88_v61 = vadd.f32 %v80_v54, %v72_v53  ;;  %v245_v18 = vld [vmem:[%s788_s4 + $0x68] sm:$0xff] }
   0xf   :  { %v90_v63 = vadd.f32 %v82_v58, %v74_v56  ;;  %v247_v16 = vld [vmem:[%s788_s4 + $0x78] sm:$0xff]  ;;  %v246_v17 = vld [vmem:[%s788_s4 + $0x70] sm:$0xff]  ;;  %v244_v19 = vld [vmem:[%s788_s4 + $0x60] sm:$0xff] }
  0x10   :  { %v89_v62 = vadd.f32 %v81_v57, %v73_v55  ;;  %v91_v1 = vadd.f32 %v83_v59, %v75_v60  ;;  %481 = vmatpush3.msra.mxu1 %v247_v16  ;;  %v243_v20 = vld [vmem:[%s788_s4 + $0x58] sm:$0xff]  ;;  %v242_v21 = vld [vmem:[%s788_s4 + $0x50] sm:$0xff]  ;;  %v241_v22 = vld [vmem:[%s788_s4 + $0x48] sm:$0xff] }
  0x11   :  { %482 = vmatprep.subr.mxu1 %v521_v0  ;;  %v240_v23 = vld [vmem:[%s788_s4 + $0x40] sm:$0xff]  ;;  %v239_v24 = vld [vmem:[%s788_s4 + $0x38] sm:$0xff]  ;;  %v238_v25 = vld [vmem:[%s788_s4 + $0x30] sm:$0xff] }
  0x12   :  { %v131_v4 = vadd.f32 %v89_v62, %v88_v61  ;;  %483 = vmatpush3.msra.mxu1 %v246_v17  ;;  %v237_v26 = vld [vmem:[%s788_s4 + $0x28] sm:$0xff]  ;;  %v236_v27 = vld [vmem:[%s788_s4 + $0x20] sm:$0xff]  ;;  %v235_v28 = vld [vmem:[%s788_s4 + $0x18] sm:$0xff] }
  0x13   :  { %v127_v2 = vld [vmem:[#allocation2 + $0x8] sm:$0xf]  ;;  %484 = vmatprep.subr.mxu1 %v521_v0  ;;  %v149_v33 = vld [vmem:[%s789_s2] sm:$0xff]  ;;  %v234_v38 = vld [vmem:[%s788_s4 + $0x10] sm:$0xff] }
  0x14   :  { %v128_v3 = vld [vmem:[#allocation2 + $0x20] sm:$0xf]  ;;  %v129_v5 = vld [vmem:[#allocation2 + $0x28] sm:$0xf]  ;;  %v137_v7 = vsel %vm136_vm0, %v127_v2, 0.0  ;;  %v132_v13 = vadd.f32 %v131_v4, %v90_v63  ;;  %485 = vmatpush3.msra.mxu1 %v245_v18  ;;  %v352_v51 = vld [vmem:[%s793_s6 + $0x38] sm:$0xff] }
  0x15   :  { %v130_v6 = vld [vmem:[#allocation2 + $0x38] sm:$0xf]  ;;  %v138_v8 = vsel %vm136_vm0, %v128_v3, 0.0  ;;  %v140_v10 = vsel %vm136_vm0, %v129_v5, 0.0  ;;  %486 = vmatprep.subr.mxu1 %v521_v0  ;;  %v150_v29 = vld [vmem:[%s789_s2 + $0x8] sm:$0xf] }
  0x16   :  { %v139_v9 = vadd.f32 %v138_v8, %v137_v7  ;;  %v142_v11 = vsel %vm136_vm0, %v130_v6, 0.0  ;;  %v133_v15 = vadd.f32 %v132_v13, %v91_v1  ;;  %487 = vmatpush3.msra.mxu1 %v244_v19  ;;  %v148_v37 = vld [vmem:[%s790_s1] sm:$0xf]  ;;  %v233_v39 = vld [vmem:[%s788_s4 + $0x8] sm:$0xff]  ;;  %v351_v52 = vld [vmem:[%s793_s6 + $0x30] sm:$0xff] }
  0x17   :  { %488 = vmatprep.subr.mxu1 %v521_v0  ;;  %v232_v40 = vld [vmem:[%s788_s4] sm:$0xff]  ;;  %v350_v53 = vld [vmem:[%s793_s6 + $0x28] sm:$0xff]  ;;  %v348_v55 = vld [vmem:[%s793_s6 + $0x18] sm:$0xff] }
  0x18   :  { %v141_v12 = vadd.f32 %v140_v10, %v139_v9  ;;  %489 = vmatpush3.msra.mxu1 %v243_v20  ;;  %v153_v41 = vld [vmem:[%s791_s3] sm:$0xf]  ;;  %v347_v56 = vld [vmem:[%s793_s6 + $0x10] sm:$0xff]  ;;  %v346_v57 = vld [vmem:[%s793_s6 + $0x8] sm:$0xff] }
  0x19   :  { %490 = vmatprep.subr.mxu1 %v521_v0  ;;  %v248_v46 = vld [vmem:[%s792_s5] sm:$0xf] }
  0x1a   :  { %v143_v14 = vadd.f32 %v142_v11, %v141_v12  ;;  %491 = vmatpush3.msra.mxu1 %v242_v21  ;;  %v349_v54 = vld [vmem:[%s793_s6 + $0x20] sm:$0xff] }
  0x1b   :  { %492 = vmatprep.subr.mxu1 %v521_v0  ;;  %v345_v58 = vld [vmem:[%s793_s6] sm:$0xff] }
  0x1c   :  { %144 = vadd.xlane.f32.xlu0 %v143_v14  ;;  %493 = vmatpush3.msra.mxu1 %v241_v22 }
  0x1d   :  { %494 = vmatprep.subr.mxu1 %v521_v0 }
  0x1e   :  { %495 = vmatpush3.msra.mxu1 %v240_v23 }
  0x1f   :  { %496 = vmatprep.subr.mxu1 %v521_v0 }
  0x20   :  { %134 = vadd.xlane.f32.xlu0 %v133_v15  ;;  %497 = vmatpush3.msra.mxu1 %v239_v24 }
  0x21   :  { %498 = vmatprep.subr.mxu1 %v521_v0 }
  0x22   :  { %499 = vmatpush3.msra.mxu1 %v238_v25 }
  0x23   :  { %500 = vmatprep.subr.mxu1 %v521_v0 }
  0x24   :  { %501 = vmatpush3.msra.mxu1 %v237_v26 }
  0x25   :  { %502 = vmatprep.subr.mxu1 %v521_v0 }
  0x26   :  { %503 = vmatpush3.msra.mxu1 %v236_v27 }
  0x27   :  { %504 = vmatprep.subr.mxu1 %v521_v0 }
  0x28   :  { %505 = vmatpush3.msra.mxu1 %v235_v28 }
  0x29   :  { %506 = vmatprep.subr.mxu1 %v521_v0 }
  0x2a   :  { %507 = vmatpush3.msra.mxu1 %v234_v38 }
  0x2b   :  { %508 = vmatprep.subr.mxu1 %v521_v0 }
  0x2c   :  { %509 = vmatpush3.msra.mxu1 %v233_v39 }
  0x2d   :  { %510 = vmatprep.subr.mxu1 %v521_v0 }
  0x2e   :  { %511 = vmatpush3.msra.mxu1 %v232_v40 }
  0xa5   :  { %v145_v30 = vpop.xlane.xlu0 %144 }
  0xa6   :  { %v147_v31 = vmul.f32 0.00048828125, %v145_v30 }
  0xa8   :  { %v152_v32 = vmul.f32 %v150_v29, %v147_v31 }
  0xa9   :  { %v135_v34 = vpop.xlane.xlu0 %134 }
  0xaa   :  { %v146_v35 = vmul.f32 0.00048828125, %v135_v34  ;;  %474 = vmatpush3.msk.msra.mxu0 %vm136_vm0, %v152_v32 }
  0xab   :  { %475 = vmatprep.subr.mxu0 %v521_v0 }
  0xac   :  { %v151_v36 = vmul.f32 %v149_v33, %v146_v35 }
  0xae   :  { %476 = vmatpush3.msra.mxu0 %v151_v36 }
  0xaf   :  { %478 = vmatmul.mubr.msk.f32.vlgmr.msra.gmra.mxu0 %vm154_vm2, %v148_v37  ;;  %380 = vmatprep.subr.mxu0 %v352_v51 }
  0xb0   :  { %420 = vmatprep.mubr.f32.mxu0 %v521_v0  ;;  %381 = vmatpush1.msra.mxu0 %v351_v52 }
  0xb1   :  { %382 = vmatprep.subr.mxu0 %v350_v53 }
  0xb2   :  { %383 = vmatpush1.msra.mxu0 %v349_v54 }
  0xb3   :  { %384 = vmatprep.subr.mxu0 %v348_v55 }
  0xb4   :  { %385 = vmatpush1.msra.mxu0 %v347_v56 }
  0xb5   :  { %386 = vmatprep.subr.mxu0 %v346_v57 }
  0xb6   :  { %387 = vmatpush1.msra.mxu0 %v345_v58 }
 0x16f   :  { %v227_v42 = vpop.f32.mrf.mxu0 }
 0x170   :  { %v228_v43 = vadd.f32 %v227_v42, %v153_v41 }
 0x171   :  { %v479_v44 = vpop.f32.mrf.mxu0 }
 0x172   :  { %v231_v45 = vmax.f32 %v228_v43, 0.0 }
 0x174   :  { %513 = vmatmul.mubr.f32.vlgmr.msra.gmra.mxu1 %v231_v45 }
 0x234   :  { %v315_v47 = vpop.f32.mrf.mxu1 }
 0x235   :  { %v316_v0 = vadd.f32 %v315_v47, %v248_v46 }
 0x236   :  { %v514_v48 = vpop.f32.mrf.mxu1 }
 0x237   :  { %v319_v49 = vmul.f32 %v316_v0, %v316_v0 }
 0x239   :  { %v321_v50 = vsel %vm320_vm3, %v319_v49, 0.0 }
 0x23a   :  { %322 = vadd.xlane.f32.xlu1 %v321_v50 }
 0x2c3   :  { %v323_v59 = vpop.xlane.xlu1 %322 }
 0x2c4   :  { %517 = vrsqrt.f32 %v323_v59  ;;  %vm326_vm4 = vcmp.eq.f32.partialorder %v323_v59, inf  ;;  %v329_v62 = vand.u32 2147483648, %v323_v59  ;;  %vm328_vm5 = vcmp.eq.f32.partialorder %v323_v59, 0.0 }
 0x2d1   :  { %v518_v60 = vpop.eup %517 }
 0x2d2   :  { %v325_v61 = vmul.f32 %v518_v60, %v323_v59 }
 0x2d4   :  { %v327_v63 = vsel %vm326_vm4, %v323_v59, %v325_v61 }
 0x2d5   :  { %v330_v1 = vsel %vm328_vm5, %v329_v62, %v327_v63 }
 0x2d6   :  { %v331_v2 = vmax.f32 %v330_v1, 1e-12 }
 0x2d8   :  { %519 = vrcp.f32 %v331_v2 }
 0x2e5   :  { %v520_v3 = vpop.eup %519 }
 0x2e6   :  { %v333_v4 = vmul.f32 %v520_v3, %v316_v0 }
 0x2e8   :  { %451 = vmatmul.mubr.msk.f32.vlgmr.msra.gmra.mxu0 %vm353_vm6, %v333_v4  ;;  %v335_v5 = vrot.slane %v333_v4, 2 }
 0x2ea   :  { %v337_v6 = vmul.f32 %v335_v5, %v333_v4 }
 0x2ec   :  { %v339_v7 = vsel %vm338_vm7, %v337_v6, 0.0 }
 0x2ed   :  { %340 = vadd.xlane.f32.xlu1 %v339_v7 }
 0x376   :  { %v341_v8 = vpop.xlane.xlu1 %340 }
 0x377   :  { %v342_v9 = vmul.f32 14.285714, %v341_v8 }
 0x379   :  { %344 = vst.msk [vmem:[%s794_s7] sm:$0x3] %vm343_vm8, %v342_v9 }
 0x3a8   :  { %v422_v10 = vpop.f32.mrf.mxu0 }
 0x3a9   :  { %v427_v12 = vmul.f32 14.285714, %v422_v10 }
 0x3aa   :  { %v424_v11 = vpop.f32.mrf.mxu0 }
 0x3ab   :  { %v428_v13 = vmul.f32 14.285714, %v424_v11 }
 0x3ad   :  { %v431_v14 = vcombine.low %v427_v12, %v428_v13 }
 0x3af   :  { %452 = vst.sshfl [vmem:[%s795_s8] sm:$0x33 pattern:$0x76325410] %v431_v14 }

</bundles_post_ra>
